<compile_context>
chip_gen: v5e
topology: v5e:2x2
jax: 0.10.0
libtpu: 0.0.40
codegen_flags: <defaults>
</compile_context>

<pallas_src>
import functools

import jax
import jax.numpy as jnp
from jax.experimental import pallas as pl
from jax.experimental.pallas import tpu as pltpu

EPS = 1e-5
LANE = 128
VMEM_LIMIT = 48 * 1024 * 1024          # explicit cap, leaves headroom on v7x (64 MiB phys)
VMEM_TILE_BUDGET = 16 * 1024 * 1024    # target per-step working set (double-buffered)


def _round_up(x, m):
    return (x + m - 1) // m * m


def _choose_tile_l(l_out, ckp, cp):
    """L-tile that (a) is a multiple of 8 or == l_out, (b) divides l_out exactly (so the
    BN statistics never see padded rows), (c) keeps the double-buffered per-step working
    set under the VMEM budget."""
    bytes_per_row = 4 * (ckp + 2 * cp) * 2          # xcol tile + y1 + r tiles, x2 buffers
    max_rows = max(8, VMEM_TILE_BUDGET // bytes_per_row)
    target = min(512, int(max_rows))
    if l_out <= target:
        return l_out
    t = target - (target % 8)
    while t >= 8:
        if l_out % t == 0:
            return t
        t -= 8
    return l_out


# --------------------------- pass 1: conv1 + shortcut conv ---------------------------
def _conv1_shortcut_kernel(xcol_ref, w1_ref, ws_ref, y1_ref, r_ref, stats_ref):
    # xcol_ref: (TILE_L, CKp); w1_ref/ws_ref: (CKp, Cp)
    # y1_ref/r_ref: (TILE_L, Cp); stats_ref: (4, Cp) resident across the L-tile axis.
    xcol = xcol_ref[...]
    y1 = jnp.dot(xcol, w1_ref[...], preferred_element_type=jnp.float32)
    r = jnp.dot(xcol, ws_ref[...], preferred_element_type=jnp.float32)
    y1_ref[...] = y1
    r_ref[...] = r

    # BN statistics (sum, sum of squares) reduced over rows via an MXU ones-matmul.
    ones = jnp.ones((1, xcol.shape[0]), jnp.float32)
    upd = jnp.concatenate(
        [jnp.dot(ones, y1, preferred_element_type=jnp.float32),
         jnp.dot(ones, y1 * y1, preferred_element_type=jnp.float32),
         jnp.dot(ones, r, preferred_element_type=jnp.float32),
         jnp.dot(ones, r * r, preferred_element_type=jnp.float32)],
        axis=0)                                       # (4, Cp)

    @pl.when(pl.program_id(1) == 0)
    def _():
        stats_ref[...] = jnp.zeros_like(stats_ref)

    stats_ref[...] += upd


# ------------------- pass 2: BN(conv1) + ReLU + conv2 (+ its BN stats) -----------------
def _bn_relu_conv2_kernel(y1_ref, a1_ref, b1_ref, w2_ref, y2_ref, stats_ref, hp_ref):
    # y1_ref: (Lout, Cp); a1/b1: (1, Cp); w2_ref: (K, Cp, Cp)
    # y2_ref: (Lout, Cp); stats_ref: (2, Cp); hp_ref scratch: (Lout + 2*pad, Cp)
    k = w2_ref.shape[0]
    pad = k // 2
    l_out = y1_ref.shape[0]

    # shared BN applied as a per-channel affine, then ReLU
    h = jnp.maximum(a1_ref[...] * y1_ref[...] + b1_ref[...], 0.0)

    # zero-padded copy of h in VMEM scratch (single copy, no concatenate)
    hp_ref[...] = jnp.zeros_like(hp_ref)
    hp_ref[pad:pad + l_out, :] = h

    # conv2 (stride 1, 'same' padding): K shifted-window matmuls, f32 accumulation,
    # initialised with the first tap's dot (no zero-init accumulator).
    y2 = jnp.dot(hp_ref[0:l_out, :], w2_ref[0], preferred_element_type=jnp.float32)
    for t in range(1, k):
        y2 = y2 + jnp.dot(hp_ref[t:t + l_out, :], w2_ref[t],
                          preferred_element_type=jnp.float32)
    y2_ref[...] = y2

    ones = jnp.ones((1, l_out), jnp.float32)
    stats_ref[...] = jnp.concatenate(
        [jnp.dot(ones, y2, preferred_element_type=jnp.float32),
         jnp.dot(ones, y2 * y2, preferred_element_type=jnp.float32)],
        axis=0)                                       # (2, Cp)


# ----------------- pass 3: BN(conv2) + shortcut BN + residual add + ReLU ---------------
def _bn_add_relu_kernel(y2_ref, r_ref, a2_ref, b2_ref, as_ref, bs_ref, out_ref):
    y2 = a2_ref[...] * y2_ref[...] + b2_ref[...]
    res = as_ref[...] * r_ref[...] + bs_ref[...]
    out_ref[...] = jnp.maximum(y2 + res, 0.0)


def _bn_affine(s, ssq, count, gamma_p, beta_p):
    # training-mode BatchNorm1d: biased batch statistics; folded into y -> a*y + b.
    mean = s / count
    var = jnp.maximum(ssq / count - mean * mean, 0.0)
    a = gamma_p * jax.lax.rsqrt(var + EPS)
    b = beta_p - a * mean
    return a.reshape(1, -1), b.reshape(1, -1)


@functools.partial(jax.jit, static_argnames=("kernel_size", "stride"))
def residual_conv_block(x, params, *, kernel_size, stride):
    """x: (N, Cin, L) float32 (PyTorch NCL layout). Returns (N, Cout, Lout)."""
    N, Cin, L = x.shape
    K = kernel_size
    assert K % 2 == 1, "even kernel_size with padding=K//2 misaligns main vs shortcut path"
    pad = K // 2
    Cout = params["w1"].shape[0]
    Lout = (L + 2 * pad - K) // stride + 1

    Cp = _round_up(Cout, LANE)
    CK = Cin * K
    CKp = _round_up(CK, LANE)
    tile_l = _choose_tile_l(Lout, CKp, Cp)
    n_lt = Lout // tile_l
    count = jnp.float32(N * Lout)
    f32 = jnp.float32
    x = x.astype(f32)

    # ---- wrapper glue: im2col (tap-major) + zero-padded / embedded weights ----
    # TODO(synk): build the conv1 im2col windows in-kernel (overlapping strided windows
    # are not expressible with non-overlapping BlockSpec tiles); here it ships ~K x bytes.
    x_pad = jnp.pad(x, ((0, 0), (0, 0), (pad, pad)))
    taps = [x_pad[:, :, t:t + stride * (Lout - 1) + 1:stride] for t in range(K)]
    xcol = jnp.stack(taps, axis=1)                         # (N, K, Cin, Lout)
    xcol = jnp.transpose(xcol, (0, 3, 1, 2)).reshape(N, Lout, CK)
    xcol = jnp.pad(xcol, ((0, 0), (0, 0), (0, CKp - CK)))  # (N, Lout, CKp) lane-dense

    w1 = jnp.transpose(params["w1"].astype(f32), (2, 1, 0)).reshape(CK, Cout)
    w1p = jnp.pad(w1, ((0, CKp - CK), (0, Cp - Cout)))
    # 1x1 strided shortcut conv == the centre tap of the same im2col -> embed its weight.
    ws = jnp.transpose(params["ws"][:, :, 0].astype(f32), (1, 0))          # (Cin, Cout)
    wsp = jnp.zeros((CKp, Cp), f32).at[pad * Cin:pad * Cin + Cin, :Cout].set(ws)
    w2 = jnp.transpose(params["w2"].astype(f32), (2, 1, 0))                # (K, Cout, Cout)
    w2p = jnp.zeros((K, Cp, Cp), f32).at[:, :Cout, :Cout].set(w2)

    cpad = lambda v: jnp.pad(v.astype(f32), (0, Cp - Cout))
    gamma_p, beta_p = cpad(params["gamma"]), cpad(params["beta"])
    gamma_sp, beta_sp = cpad(params["gamma_s"]), cpad(params["beta_s"])
    # NOTE: conv biases (b1/b2/bs) cancel exactly under training-mode BatchNorm -> unused.

    cparams = lambda sem: pltpu.CompilerParams(
        dimension_semantics=sem, vmem_limit_bytes=VMEM_LIMIT)

    # ---- pass 1: conv1 + shortcut conv, tiled over (N, L-tiles), BN stats of both ----
    y1, r, stats1 = pl.pallas_call(
        _conv1_shortcut_kernel,
        grid=(N, n_lt),
        in_specs=[
            pl.BlockSpec((None, tile_l, CKp), lambda n, l: (n, l, 0)),
            pl.BlockSpec((CKp, Cp), lambda n, l: (0, 0)),
            pl.BlockSpec((CKp, Cp), lambda n, l: (0, 0)),
        ],
        out_specs=[
            pl.BlockSpec((None, tile_l, Cp), lambda n, l: (n, l, 0)),
            pl.BlockSpec((None, tile_l, Cp), lambda n, l: (n, l, 0)),
            pl.BlockSpec((None, 4, Cp), lambda n, l: (n, 0, 0)),
        ],
        out_shape=[
            jax.ShapeDtypeStruct((N, Lout, Cp), f32),
            jax.ShapeDtypeStruct((N, Lout, Cp), f32),
            jax.ShapeDtypeStruct((N, 4, Cp), f32),
        ],
        compiler_params=cparams(("parallel", "arbitrary")),
    )(xcol, w1p, wsp)

    s1 = jnp.sum(stats1, axis=0)         # (4, Cp): [sum y1, sum y1^2, sum r, sum r^2]
    a1, b1 = _bn_affine(s1[0], s1[1], count, gamma_p, beta_p)
    a_s, b_s = _bn_affine(s1[2], s1[3], count, gamma_sp, beta_sp)

    # ---- pass 2: BN + ReLU + conv2 per sequence, BN stats of conv2 output ----
    # TODO(synk): for very long sequences, tile L here too (needs a K//2 halo exchange).
    y2, stats2 = pl.pallas_call(
        _bn_relu_conv2_kernel,
        grid=(N,),
        in_specs=[
            pl.BlockSpec((None, Lout, Cp), lambda n: (n, 0, 0)),
            pl.BlockSpec((1, Cp), lambda n: (0, 0)),
            pl.BlockSpec((1, Cp), lambda n: (0, 0)),
            pl.BlockSpec((K, Cp, Cp), lambda n: (0, 0, 0)),
        ],
        out_specs=[
            pl.BlockSpec((None, Lout, Cp), lambda n: (n, 0, 0)),
            pl.BlockSpec((None, 2, Cp), lambda n: (n, 0, 0)),
        ],
        out_shape=[
            jax.ShapeDtypeStruct((N, Lout, Cp), f32),
            jax.ShapeDtypeStruct((N, 2, Cp), f32),
        ],
        scratch_shapes=[pltpu.VMEM((Lout + 2 * pad, Cp), f32)],
        compiler_params=cparams(("parallel",)),
    )(y1, a1, b1, w2p)

    s2 = jnp.sum(stats2, axis=0)
    a2, b2 = _bn_affine(s2[0], s2[1], count, gamma_p, beta_p)

    # ---- pass 3: BN(conv2) + shortcut BN + residual add + ReLU, fully parallel ----
    out_p = pl.pallas_call(
        _bn_add_relu_kernel,
        grid=(N, n_lt),
        in_specs=[
            pl.BlockSpec((None, tile_l, Cp), lambda n, l: (n, l, 0)),
            pl.BlockSpec((None, tile_l, Cp), lambda n, l: (n, l, 0)),
            pl.BlockSpec((1, Cp), lambda n, l: (0, 0)),
            pl.BlockSpec((1, Cp), lambda n, l: (0, 0)),
            pl.BlockSpec((1, Cp), lambda n, l: (0, 0)),
            pl.BlockSpec((1, Cp), lambda n, l: (0, 0)),
        ],
        out_specs=pl.BlockSpec((None, tile_l, Cp), lambda n, l: (n, l, 0)),
        out_shape=jax.ShapeDtypeStruct((N, Lout, Cp), f32),
        compiler_params=cparams(("parallel", "parallel")),
    )(y2, r, a2, b2, a_s, b_s)

    return jnp.transpose(out_p[:, :, :Cout], (0, 2, 1))    # back to (N, Cout, Lout)


# ---------------- pure-JAX reference (for validation only) ----------------
def _conv1d(x, w, b, stride, padding):
    y = jax.lax.conv_general_dilated(
        x, w, window_strides=(stride,), padding=[(padding, padding)],
        dimension_numbers=("NCH", "OIH", "NCH"))
    return y + b[None, :, None]


def _bn_nc_l(y, gamma, beta):
    mean = y.mean(axis=(0, 2), keepdims=True)
    var = ((y - mean) ** 2).mean(axis=(0, 2), keepdims=True)
    return gamma[None, :, None] * (y - mean) / jnp.sqrt(var + EPS) + beta[None, :, None]


def reference_forward(x, p, *, kernel_size, stride):
    residual = _bn_nc_l(_conv1d(x, p["ws"], p["bs"], stride, 0), p["gamma_s"], p["beta_s"])
    h = jax.nn.relu(_bn_nc_l(_conv1d(x, p["w1"], p["b1"], stride, kernel_size // 2),
                             p["gamma"], p["beta"]))
    y = _bn_nc_l(_conv1d(h, p["w2"], p["b2"], 1, kernel_size // 2), p["gamma"], p["beta"])
    return jax.nn.relu(y + residual)


if __name__ == "__main__":
    N, Cin, Cout, L, K, stride = 2, 4, 8, 16, 3, 2

    key = jax.random.PRNGKey(0)
    ks = jax.random.split(key, 9)
    params = {
        "w1": 0.2 * jax.random.normal(ks[0], (Cout, Cin, K), jnp.float32),
        "b1": 0.1 * jax.random.normal(ks[1], (Cout,), jnp.float32),
        "w2": 0.2 * jax.random.normal(ks[2], (Cout, Cout, K), jnp.float32),
        "b2": 0.1 * jax.random.normal(ks[3], (Cout,), jnp.float32),
        "gamma": 1.0 + 0.1 * jax.random.normal(ks[4], (Cout,), jnp.float32),
        "beta": 0.1 * jax.random.normal(ks[5], (Cout,), jnp.float32),
        "ws": 0.2 * jax.random.normal(ks[6], (Cout, Cin, 1), jnp.float32),
        "bs": 0.1 * jax.random.normal(ks[7], (Cout,), jnp.float32),
        "gamma_s": jnp.ones((Cout,), jnp.float32),
        "beta_s": jnp.zeros((Cout,), jnp.float32),
    }

    x = jax.random.normal(ks[8], (N, Cin, L), jnp.float32)

    out = residual_conv_block(x, params, kernel_size=K, stride=stride)
    out = jax.block_until_ready(out)

    ref = reference_forward(x, params, kernel_size=K, stride=stride)
    assert out.shape == ref.shape, (out.shape, ref.shape)
    err = float(jnp.max(jnp.abs(out - ref)))
    assert jnp.allclose(out, ref, atol=1e-4, rtol=1e-4), err

    print("KERNEL_OK")
</pallas_src>

<mosaic_0001>
module attributes {stable_mosaic.version = 11 : i64} {
  func.func @_bn_relu_conv2_kernel(%arg0: i32, %arg1: memref<1x8x128xf32, #tpu.memory_space<vmem>>, %arg2: memref<1x128xf32, #tpu.memory_space<vmem>>, %arg3: memref<1x128xf32, #tpu.memory_space<vmem>>, %arg4: memref<3x128x128xf32, #tpu.memory_space<vmem>>, %arg5: memref<1x8x128xf32, #tpu.memory_space<vmem>>, %arg6: memref<1x2x128xf32, #tpu.memory_space<vmem>>, %arg7: memref<10x128xf32, #tpu.memory_space<vmem>>) attributes {dimension_semantics = [#tpu.dimension_semantics<parallel>], iteration_bounds = array<i64: 2>, scalar_prefetch = 0 : i64, scratch_operands = 1 : i64, tpu.core_type = #tpu.core_type<tc>, window_params = [{transform_indices = @transform_0, window_bounds = array<i64: 1, 8, 128>}, {pipeline_mode = #tpu.pipeline_mode<synchronous>, transform_indices = @transform_1, window_bounds = array<i64: 1, 128>}, {pipeline_mode = #tpu.pipeline_mode<synchronous>, transform_indices = @transform_2, window_bounds = array<i64: 1, 128>}, {pipeline_mode = #tpu.pipeline_mode<synchronous>, transform_indices = @transform_3, window_bounds = array<i64: 3, 128, 128>}, {transform_indices = @transform_4, window_bounds = array<i64: 1, 8, 128>}, {transform_indices = @transform_5, window_bounds = array<i64: 1, 2, 128>}]} {
    %c0 = arith.constant 0 : index
    %c0_0 = arith.constant 0 : index
    %0 = vector.load %arg2[%c0, %c0_0] : memref<1x128xf32, #tpu.memory_space<vmem>>, vector<1x128xf32>
    %c0_1 = arith.constant 0 : index
    %c0_2 = arith.constant 0 : index
    %c0_3 = arith.constant 0 : index
    %1 = vector.load %arg1[%c0_1, %c0_2, %c0_3] : memref<1x8x128xf32, #tpu.memory_space<vmem>>, vector<1x8x128xf32>
    %2 = vector.shape_cast %1 : vector<1x8x128xf32> to vector<8x128xf32>
    %3 = vector.broadcast %0 : vector<1x128xf32> to vector<8x128xf32>
    %4 = arith.mulf %3, %2 : vector<8x128xf32>
    %c0_4 = arith.constant 0 : index
    %c0_5 = arith.constant 0 : index
    %5 = vector.load %arg3[%c0_4, %c0_5] : memref<1x128xf32, #tpu.memory_space<vmem>>, vector<1x128xf32>
    %6 = vector.broadcast %5 : vector<1x128xf32> to vector<8x128xf32>
    %7 = arith.addf %4, %6 : vector<8x128xf32>
    %cst = arith.constant 0.000000e+00 : f32
    %8 = vector.broadcast %cst : f32 to vector<8x128xf32>
    %9 = arith.maximumf %7, %8 : vector<8x128xf32>
    %cst_6 = arith.constant 0.000000e+00 : f32
    %10 = vector.broadcast %cst_6 : f32 to vector<10x128xf32>
    %c0_7 = arith.constant 0 : index
    %c0_8 = arith.constant 0 : index
    %11 = vector.load %arg7[%c0_7, %c0_8] : memref<10x128xf32, #tpu.memory_space<vmem>>, vector<10x128xf32>
    tpu.vector_store %arg7[%c0_7, %c0_8], %10 {strides = array<i32>} : memref<10x128xf32, #tpu.memory_space<vmem>>, vector<10x128xf32>,
    %c1 = arith.constant 1 : index
    %c0_9 = arith.constant 0 : index
    %12 = vector.load %arg7[%c1, %c0_9] : memref<10x128xf32, #tpu.memory_space<vmem>>, vector<8x128xf32>
    tpu.vector_store %arg7[%c1, %c0_9], %9 {strides = array<i32>} : memref<10x128xf32, #tpu.memory_space<vmem>>, vector<8x128xf32>,
    %c0_10 = arith.constant 0 : index
    %c0_11 = arith.constant 0 : index
    %13 = vector.load %arg7[%c0_10, %c0_11] : memref<10x128xf32, #tpu.memory_space<vmem>>, vector<8x128xf32>
    %c0_12 = arith.constant 0 : index
    %c0_13 = arith.constant 0 : index
    %c0_14 = arith.constant 0 : index
    %14 = vector.load %arg4[%c0_12, %c0_13, %c0_14] : memref<3x128x128xf32, #tpu.memory_space<vmem>>, vector<1x128x128xf32>
    %15 = vector.shape_cast %14 : vector<1x128x128xf32> to vector<128x128xf32>
    %cst_15 = arith.constant dense<0.000000e+00> : vector<8x128xf32>
    %16 = tpu.matmul %13, %15, %cst_15 {dimension_numbers = #tpu.dot_dimension_numbers<[1], [0], [0], [1], [0, 0, 1, 1], [], []>} : vector<8x128xf32>, vector<128x128xf32>, vector<8x128xf32> -> vector<8x128xf32>
    %c1_16 = arith.constant 1 : index
    %c0_17 = arith.constant 0 : index
    %17 = vector.load %arg7[%c1_16, %c0_17] : memref<10x128xf32, #tpu.memory_space<vmem>>, vector<8x128xf32>
    %c1_18 = arith.constant 1 : index
    %c0_19 = arith.constant 0 : index
    %c0_20 = arith.constant 0 : index
    %18 = vector.load %arg4[%c1_18, %c0_19, %c0_20] : memref<3x128x128xf32, #tpu.memory_space<vmem>>, vector<1x128x128xf32>
    %19 = vector.shape_cast %18 : vector<1x128x128xf32> to vector<128x128xf32>
    %cst_21 = arith.constant dense<0.000000e+00> : vector<8x128xf32>
    %20 = tpu.matmul %17, %19, %cst_21 {dimension_numbers = #tpu.dot_dimension_numbers<[1], [0], [0], [1], [0, 0, 1, 1], [], []>} : vector<8x128xf32>, vector<128x128xf32>, vector<8x128xf32> -> vector<8x128xf32>
    %21 = arith.addf %16, %20 : vector<8x128xf32>
    %c2 = arith.constant 2 : index
    %c0_22 = arith.constant 0 : index
    %22 = vector.load %arg7[%c2, %c0_22] : memref<10x128xf32, #tpu.memory_space<vmem>>, vector<8x128xf32>
    %c2_23 = arith.constant 2 : index
    %c0_24 = arith.constant 0 : index
    %c0_25 = arith.constant 0 : index
    %23 = vector.load %arg4[%c2_23, %c0_24, %c0_25] : memref<3x128x128xf32, #tpu.memory_space<vmem>>, vector<1x128x128xf32>
    %24 = vector.shape_cast %23 : vector<1x128x128xf32> to vector<128x128xf32>
    %cst_26 = arith.constant dense<0.000000e+00> : vector<8x128xf32>
    %25 = tpu.matmul %22, %24, %cst_26 {dimension_numbers = #tpu.dot_dimension_numbers<[1], [0], [0], [1], [0, 0, 1, 1], [], []>} : vector<8x128xf32>, vector<128x128xf32>, vector<8x128xf32> -> vector<8x128xf32>
    %26 = arith.addf %21, %25 : vector<8x128xf32>
    %c0_27 = arith.constant 0 : index
    %c0_28 = arith.constant 0 : index
    %c0_29 = arith.constant 0 : index
    %27 = vector.load %arg5[%c0_27, %c0_28, %c0_29] : memref<1x8x128xf32, #tpu.memory_space<vmem>>, vector<1x8x128xf32>
    %28 = vector.shape_cast %27 : vector<1x8x128xf32> to vector<8x128xf32>
    %29 = vector.shape_cast %26 : vector<8x128xf32> to vector<1x8x128xf32>
    tpu.vector_store %arg5[%c0_27, %c0_28, %c0_29], %29 {strides = array<i32>} : memref<1x8x128xf32, #tpu.memory_space<vmem>>, vector<1x8x128xf32>,
    %cst_30 = arith.constant 1.000000e+00 : f32
    %30 = vector.broadcast %cst_30 : f32 to vector<1x8xf32>
    %cst_31 = arith.constant dense<0.000000e+00> : vector<1x128xf32>
    %31 = tpu.matmul %30, %26, %cst_31 {dimension_numbers = #tpu.dot_dimension_numbers<[1], [0], [0], [1], [0, 0, 1, 1], [], []>} : vector<1x8xf32>, vector<8x128xf32>, vector<1x128xf32> -> vector<1x128xf32>
    %32 = arith.mulf %26, %26 : vector<8x128xf32>
    %cst_32 = arith.constant dense<0.000000e+00> : vector<1x128xf32>
    %33 = tpu.matmul %30, %32, %cst_32 {dimension_numbers = #tpu.dot_dimension_numbers<[1], [0], [0], [1], [0, 0, 1, 1], [], []>} : vector<1x8xf32>, vector<8x128xf32>, vector<1x128xf32> -> vector<1x128xf32>
    %34 = tpu.concatenate %31, %33 in 0 : vector<1x128xf32>, vector<1x128xf32> -> vector<2x128xf32>
    %c0_33 = arith.constant 0 : index
    %c0_34 = arith.constant 0 : index
    %c0_35 = arith.constant 0 : index
    %35 = vector.load %arg6[%c0_33, %c0_34, %c0_35] : memref<1x2x128xf32, #tpu.memory_space<vmem>>, vector<1x2x128xf32>
    %36 = vector.shape_cast %35 : vector<1x2x128xf32> to vector<2x128xf32>
    %37 = vector.shape_cast %34 : vector<2x128xf32> to vector<1x2x128xf32>
    tpu.vector_store %arg6[%c0_33, %c0_34, %c0_35], %37 {strides = array<i32>} : memref<1x2x128xf32, #tpu.memory_space<vmem>>, vector<1x2x128xf32>,
    return
  }
  func.func @transform_0(%arg0: i32) -> (i32, i32, i32) {
    %c0_i32 = arith.constant 0 : i32
    %c0_i32_0 = arith.constant 0 : i32
    %c0_i32_1 = arith.constant 0 : i32
    return %arg0, %c0_i32, %c0_i32_0 : i32, i32, i32
  }
  func.func @transform_1(%arg0: i32) -> (i32, i32) {
    %c0_i32 = arith.constant 0 : i32
    %c0_i32_0 = arith.constant 0 : i32
    %c0_i32_1 = arith.constant 0 : i32
    return %c0_i32, %c0_i32_0 : i32, i32
  }
  func.func @transform_2(%arg0: i32) -> (i32, i32) {
    %c0_i32 = arith.constant 0 : i32
    %c0_i32_0 = arith.constant 0 : i32
    %c0_i32_1 = arith.constant 0 : i32
    return %c0_i32, %c0_i32_0 : i32, i32
  }
  func.func @transform_3(%arg0: i32) -> (i32, i32, i32) {
    %c0_i32 = arith.constant 0 : i32
    %c0_i32_0 = arith.constant 0 : i32
    %c0_i32_1 = arith.constant 0 : i32
    %c0_i32_2 = arith.constant 0 : i32
    return %c0_i32, %c0_i32_0, %c0_i32_1 : i32, i32, i32
  }
  func.func @transform_4(%arg0: i32) -> (i32, i32, i32) {
    %c0_i32 = arith.constant 0 : i32
    %c0_i32_0 = arith.constant 0 : i32
    %c0_i32_1 = arith.constant 0 : i32
    return %arg0, %c0_i32, %c0_i32_0 : i32, i32, i32
  }
  func.func @transform_5(%arg0: i32) -> (i32, i32, i32) {
    %c0_i32 = arith.constant 0 : i32
    %c0_i32_0 = arith.constant 0 : i32
    %c0_i32_1 = arith.constant 0 : i32
    return %arg0, %c0_i32, %c0_i32_0 : i32, i32, i32
  }
}

module attributes {stable_mosaic.version = 11 : i64} {
  func.func @_conv1_shortcut_kernel(%arg0: i32, %arg1: i32, %arg2: memref<1x8x128xf32, #tpu.memory_space<vmem>>, %arg3: memref<128x128xf32, #tpu.memory_space<vmem>>, %arg4: memref<128x128xf32, #tpu.memory_space<vmem>>, %arg5: memref<1x8x128xf32, #tpu.memory_space<vmem>>, %arg6: memref<1x8x128xf32, #tpu.memory_space<vmem>>, %arg7: memref<1x4x128xf32, #tpu.memory_space<vmem>>) attributes {dimension_semantics = [#tpu.dimension_semantics<parallel>, #tpu.dimension_semantics<arbitrary>], iteration_bounds = array<i64: 2, 1>, scalar_prefetch = 0 : i64, scratch_operands = 0 : i64, tpu.core_type = #tpu.core_type<tc>, window_params = [{transform_indices = @transform_0, window_bounds = array<i64: 1, 8, 128>}, {pipeline_mode = #tpu.pipeline_mode<synchronous>, transform_indices = @transform_1, window_bounds = array<i64: 128, 128>}, {pipeline_mode = #tpu.pipeline_mode<synchronous>, transform_indices = @transform_2, window_bounds = array<i64: 128, 128>}, {transform_indices = @transform_3, window_bounds = array<i64: 1, 8, 128>}, {transform_indices = @transform_4, window_bounds = array<i64: 1, 8, 128>}, {transform_indices = @transform_5, window_bounds = array<i64: 1, 4, 128>}]} {
    %c0 = arith.constant 0 : index
    %c0_0 = arith.constant 0 : index
    %c0_1 = arith.constant 0 : index
    %0 = vector.load %arg2[%c0, %c0_0, %c0_1] : memref<1x8x128xf32, #tpu.memory_space<vmem>>, vector<1x8x128xf32>
    %1 = vector.shape_cast %0 : vector<1x8x128xf32> to vector<8x128xf32>
    %c0_2 = arith.constant 0 : index
    %c0_3 = arith.constant 0 : index
    %2 = vector.load %arg3[%c0_2, %c0_3] : memref<128x128xf32, #tpu.memory_space<vmem>>, vector<128x128xf32>
    %cst = arith.constant dense<0.000000e+00> : vector<8x128xf32>
    %3 = tpu.matmul %1, %2, %cst {dimension_numbers = #tpu.dot_dimension_numbers<[1], [0], [0], [1], [0, 0, 1, 1], [], []>} : vector<8x128xf32>, vector<128x128xf32>, vector<8x128xf32> -> vector<8x128xf32>
    %c0_4 = arith.constant 0 : index
    %c0_5 = arith.constant 0 : index
    %4 = vector.load %arg4[%c0_4, %c0_5] : memref<128x128xf32, #tpu.memory_space<vmem>>, vector<128x128xf32>
    %cst_6 = arith.constant dense<0.000000e+00> : vector<8x128xf32>
    %5 = tpu.matmul %1, %4, %cst_6 {dimension_numbers = #tpu.dot_dimension_numbers<[1], [0], [0], [1], [0, 0, 1, 1], [], []>} : vector<8x128xf32>, vector<128x128xf32>, vector<8x128xf32> -> vector<8x128xf32>
    %c0_7 = arith.constant 0 : index
    %c0_8 = arith.constant 0 : index
    %c0_9 = arith.constant 0 : index
    %6 = vector.load %arg5[%c0_7, %c0_8, %c0_9] : memref<1x8x128xf32, #tpu.memory_space<vmem>>, vector<1x8x128xf32>
    %7 = vector.shape_cast %6 : vector<1x8x128xf32> to vector<8x128xf32>
    %8 = vector.shape_cast %3 : vector<8x128xf32> to vector<1x8x128xf32>
    tpu.vector_store %arg5[%c0_7, %c0_8, %c0_9], %8 {strides = array<i32>} : memref<1x8x128xf32, #tpu.memory_space<vmem>>, vector<1x8x128xf32>,
    %c0_10 = arith.constant 0 : index
    %c0_11 = arith.constant 0 : index
    %c0_12 = arith.constant 0 : index
    %9 = vector.load %arg6[%c0_10, %c0_11, %c0_12] : memref<1x8x128xf32, #tpu.memory_space<vmem>>, vector<1x8x128xf32>
    %10 = vector.shape_cast %9 : vector<1x8x128xf32> to vector<8x128xf32>
    %11 = vector.shape_cast %5 : vector<8x128xf32> to vector<1x8x128xf32>
    tpu.vector_store %arg6[%c0_10, %c0_11, %c0_12], %11 {strides = array<i32>} : memref<1x8x128xf32, #tpu.memory_space<vmem>>, vector<1x8x128xf32>,
    %cst_13 = arith.constant 1.000000e+00 : f32
    %12 = vector.broadcast %cst_13 : f32 to vector<1x8xf32>
    %cst_14 = arith.constant dense<0.000000e+00> : vector<1x128xf32>
    %13 = tpu.matmul %12, %3, %cst_14 {dimension_numbers = #tpu.dot_dimension_numbers<[1], [0], [0], [1], [0, 0, 1, 1], [], []>} : vector<1x8xf32>, vector<8x128xf32>, vector<1x128xf32> -> vector<1x128xf32>
    %14 = arith.mulf %3, %3 : vector<8x128xf32>
    %cst_15 = arith.constant dense<0.000000e+00> : vector<1x128xf32>
    %15 = tpu.matmul %12, %14, %cst_15 {dimension_numbers = #tpu.dot_dimension_numbers<[1], [0], [0], [1], [0, 0, 1, 1], [], []>} : vector<1x8xf32>, vector<8x128xf32>, vector<1x128xf32> -> vector<1x128xf32>
    %cst_16 = arith.constant dense<0.000000e+00> : vector<1x128xf32>
    %16 = tpu.matmul %12, %5, %cst_16 {dimension_numbers = #tpu.dot_dimension_numbers<[1], [0], [0], [1], [0, 0, 1, 1], [], []>} : vector<1x8xf32>, vector<8x128xf32>, vector<1x128xf32> -> vector<1x128xf32>
    %17 = arith.mulf %5, %5 : vector<8x128xf32>
    %cst_17 = arith.constant dense<0.000000e+00> : vector<1x128xf32>
    %18 = tpu.matmul %12, %17, %cst_17 {dimension_numbers = #tpu.dot_dimension_numbers<[1], [0], [0], [1], [0, 0, 1, 1], [], []>} : vector<1x8xf32>, vector<8x128xf32>, vector<1x128xf32> -> vector<1x128xf32>
    %19 = tpu.concatenate %13, %15, %16, %18 in 0 : vector<1x128xf32>, vector<1x128xf32>, vector<1x128xf32>, vector<1x128xf32> -> vector<4x128xf32>
    %c0_i32 = arith.constant 0 : i32
    %20 = arith.cmpi eq, %arg1, %c0_i32 : i32
    %21 = arith.extui %20 : i1 to i32
    %c0_i32_18 = arith.constant 0 : i32
    %22 = arith.cmpi ne, %21, %c0_i32_18 : i32
    scf.if %22 {
      %cst_25 = arith.constant 0.000000e+00 : f32
      %29 = vector.broadcast %cst_25 : f32 to vector<4x128xf32>
      %c0_26 = arith.constant 0 : index
      %c0_27 = arith.constant 0 : index
      %c0_28 = arith.constant 0 : index
      %30 = vector.load %arg7[%c0_26, %c0_27, %c0_28] : memref<1x4x128xf32, #tpu.memory_space<vmem>>, vector<1x4x128xf32>
      %31 = vector.shape_cast %30 : vector<1x4x128xf32> to vector<4x128xf32>
      %32 = vector.shape_cast %29 : vector<4x128xf32> to vector<1x4x128xf32>
      tpu.vector_store %arg7[%c0_26, %c0_27, %c0_28], %32 {strides = array<i32>} : memref<1x4x128xf32, #tpu.memory_space<vmem>>, vector<1x4x128xf32>,
    } else {
    }
    %c0_19 = arith.constant 0 : index
    %c0_20 = arith.constant 0 : index
    %c0_21 = arith.constant 0 : index
    %23 = vector.load %arg7[%c0_19, %c0_20, %c0_21] : memref<1x4x128xf32, #tpu.memory_space<vmem>>, vector<1x4x128xf32>
    %24 = vector.shape_cast %23 : vector<1x4x128xf32> to vector<4x128xf32>
    %25 = arith.addf %24, %19 : vector<4x128xf32>
    %c0_22 = arith.constant 0 : index
    %c0_23 = arith.constant 0 : index
    %c0_24 = arith.constant 0 : index
    %26 = vector.load %arg7[%c0_22, %c0_23, %c0_24] : memref<1x4x128xf32, #tpu.memory_space<vmem>>, vector<1x4x128xf32>
    %27 = vector.shape_cast %26 : vector<1x4x128xf32> to vector<4x128xf32>
    %28 = vector.shape_cast %25 : vector<4x128xf32> to vector<1x4x128xf32>
    tpu.vector_store %arg7[%c0_22, %c0_23, %c0_24], %28 {strides = array<i32>} : memref<1x4x128xf32, #tpu.memory_space<vmem>>, vector<1x4x128xf32>,
    return
  }
  func.func @transform_0(%arg0: i32, %arg1: i32) -> (i32, i32, i32) {
    %c0_i32 = arith.constant 0 : i32
    %c0_i32_0 = arith.constant 0 : i32
    return %arg0, %arg1, %c0_i32 : i32, i32, i32
  }
  func.func @transform_1(%arg0: i32, %arg1: i32) -> (i32, i32) {
    %c0_i32 = arith.constant 0 : i32
    %c0_i32_0 = arith.constant 0 : i32
    %c0_i32_1 = arith.constant 0 : i32
    return %c0_i32, %c0_i32_0 : i32, i32
  }
  func.func @transform_2(%arg0: i32, %arg1: i32) -> (i32, i32) {
    %c0_i32 = arith.constant 0 : i32
    %c0_i32_0 = arith.constant 0 : i32
    %c0_i32_1 = arith.constant 0 : i32
    return %c0_i32, %c0_i32_0 : i32, i32
  }
  func.func @transform_3(%arg0: i32, %arg1: i32) -> (i32, i32, i32) {
    %c0_i32 = arith.constant 0 : i32
    %c0_i32_0 = arith.constant 0 : i32
    return %arg0, %arg1, %c0_i32 : i32, i32, i32
  }
  func.func @transform_4(%arg0: i32, %arg1: i32) -> (i32, i32, i32) {
    %c0_i32 = arith.constant 0 : i32
    %c0_i32_0 = arith.constant 0 : i32
    return %arg0, %arg1, %c0_i32 : i32, i32, i32
  }
  func.func @transform_5(%arg0: i32, %arg1: i32) -> (i32, i32, i32) {
    %c0_i32 = arith.constant 0 : i32
    %c0_i32_0 = arith.constant 0 : i32
    %c0_i32_1 = arith.constant 0 : i32
    return %arg0, %c0_i32, %c0_i32_0 : i32, i32, i32
  }
}

module attributes {stable_mosaic.version = 11 : i64} {
  func.func @_bn_add_relu_kernel(%arg0: i32, %arg1: i32, %arg2: memref<1x8x128xf32, #tpu.memory_space<vmem>>, %arg3: memref<1x8x128xf32, #tpu.memory_space<vmem>>, %arg4: memref<1x128xf32, #tpu.memory_space<vmem>>, %arg5: memref<1x128xf32, #tpu.memory_space<vmem>>, %arg6: memref<1x128xf32, #tpu.memory_space<vmem>>, %arg7: memref<1x128xf32, #tpu.memory_space<vmem>>, %arg8: memref<1x8x128xf32, #tpu.memory_space<vmem>>) attributes {dimension_semantics = [#tpu.dimension_semantics<parallel>, #tpu.dimension_semantics<parallel>], iteration_bounds = array<i64: 2, 1>, scalar_prefetch = 0 : i64, scratch_operands = 0 : i64, tpu.core_type = #tpu.core_type<tc>, window_params = [{transform_indices = @transform_0, window_bounds = array<i64: 1, 8, 128>}, {transform_indices = @transform_1, window_bounds = array<i64: 1, 8, 128>}, {pipeline_mode = #tpu.pipeline_mode<synchronous>, transform_indices = @transform_2, window_bounds = array<i64: 1, 128>}, {pipeline_mode = #tpu.pipeline_mode<synchronous>, transform_indices = @transform_3, window_bounds = array<i64: 1, 128>}, {pipeline_mode = #tpu.pipeline_mode<synchronous>, transform_indices = @transform_4, window_bounds = array<i64: 1, 128>}, {pipeline_mode = #tpu.pipeline_mode<synchronous>, transform_indices = @transform_5, window_bounds = array<i64: 1, 128>}, {transform_indices = @transform_6, window_bounds = array<i64: 1, 8, 128>}]} {
    %c0 = arith.constant 0 : index
    %c0_0 = arith.constant 0 : index
    %0 = vector.load %arg4[%c0, %c0_0] : memref<1x128xf32, #tpu.memory_space<vmem>>, vector<1x128xf32>
    %c0_1 = arith.constant 0 : index
    %c0_2 = arith.constant 0 : index
    %c0_3 = arith.constant 0 : index
    %1 = vector.load %arg2[%c0_1, %c0_2, %c0_3] : memref<1x8x128xf32, #tpu.memory_space<vmem>>, vector<1x8x128xf32>
    %2 = vector.shape_cast %1 : vector<1x8x128xf32> to vector<8x128xf32>
    %3 = vector.broadcast %0 : vector<1x128xf32> to vector<8x128xf32>
    %4 = arith.mulf %3, %2 : vector<8x128xf32>
    %c0_4 = arith.constant 0 : index
    %c0_5 = arith.constant 0 : index
    %5 = vector.load %arg5[%c0_4, %c0_5] : memref<1x128xf32, #tpu.memory_space<vmem>>, vector<1x128xf32>
    %6 = vector.broadcast %5 : vector<1x128xf32> to vector<8x128xf32>
    %7 = arith.addf %4, %6 : vector<8x128xf32>
    %c0_6 = arith.constant 0 : index
    %c0_7 = arith.constant 0 : index
    %8 = vector.load %arg6[%c0_6, %c0_7] : memref<1x128xf32, #tpu.memory_space<vmem>>, vector<1x128xf32>
    %c0_8 = arith.constant 0 : index
    %c0_9 = arith.constant 0 : index
    %c0_10 = arith.constant 0 : index
    %9 = vector.load %arg3[%c0_8, %c0_9, %c0_10] : memref<1x8x128xf32, #tpu.memory_space<vmem>>, vector<1x8x128xf32>
    %10 = vector.shape_cast %9 : vector<1x8x128xf32> to vector<8x128xf32>
    %11 = vector.broadcast %8 : vector<1x128xf32> to vector<8x128xf32>
    %12 = arith.mulf %11, %10 : vector<8x128xf32>
    %c0_11 = arith.constant 0 : index
    %c0_12 = arith.constant 0 : index
    %13 = vector.load %arg7[%c0_11, %c0_12] : memref<1x128xf32, #tpu.memory_space<vmem>>, vector<1x128xf32>
    %14 = vector.broadcast %13 : vector<1x128xf32> to vector<8x128xf32>
    %15 = arith.addf %12, %14 : vector<8x128xf32>
    %16 = arith.addf %7, %15 : vector<8x128xf32>
    %cst = arith.constant 0.000000e+00 : f32
    %17 = vector.broadcast %cst : f32 to vector<8x128xf32>
    %18 = arith.maximumf %16, %17 : vector<8x128xf32>
    %c0_13 = arith.constant 0 : index
    %c0_14 = arith.constant 0 : index
    %c0_15 = arith.constant 0 : index
    %19 = vector.load %arg8[%c0_13, %c0_14, %c0_15] : memref<1x8x128xf32, #tpu.memory_space<vmem>>, vector<1x8x128xf32>
    %20 = vector.shape_cast %19 : vector<1x8x128xf32> to vector<8x128xf32>
    %21 = vector.shape_cast %18 : vector<8x128xf32> to vector<1x8x128xf32>
    tpu.vector_store %arg8[%c0_13, %c0_14, %c0_15], %21 {strides = array<i32>} : memref<1x8x128xf32, #tpu.memory_space<vmem>>, vector<1x8x128xf32>,
    return
  }
  func.func @transform_0(%arg0: i32, %arg1: i32) -> (i32, i32, i32) {
    %c0_i32 = arith.constant 0 : i32
    %c0_i32_0 = arith.constant 0 : i32
    return %arg0, %arg1, %c0_i32 : i32, i32, i32
  }
  func.func @transform_1(%arg0: i32, %arg1: i32) -> (i32, i32, i32) {
    %c0_i32 = arith.constant 0 : i32
    %c0_i32_0 = arith.constant 0 : i32
    return %arg0, %arg1, %c0_i32 : i32, i32, i32
  }
  func.func @transform_2(%arg0: i32, %arg1: i32) -> (i32, i32) {
    %c0_i32 = arith.constant 0 : i32
    %c0_i32_0 = arith.constant 0 : i32
    %c0_i32_1 = arith.constant 0 : i32
    return %c0_i32, %c0_i32_0 : i32, i32
  }
  func.func @transform_3(%arg0: i32, %arg1: i32) -> (i32, i32) {
    %c0_i32 = arith.constant 0 : i32
    %c0_i32_0 = arith.constant 0 : i32
    %c0_i32_1 = arith.constant 0 : i32
    return %c0_i32, %c0_i32_0 : i32, i32
  }
  func.func @transform_4(%arg0: i32, %arg1: i32) -> (i32, i32) {
    %c0_i32 = arith.constant 0 : i32
    %c0_i32_0 = arith.constant 0 : i32
    %c0_i32_1 = arith.constant 0 : i32
    return %c0_i32, %c0_i32_0 : i32, i32
  }
  func.func @transform_5(%arg0: i32, %arg1: i32) -> (i32, i32) {
    %c0_i32 = arith.constant 0 : i32
    %c0_i32_0 = arith.constant 0 : i32
    %c0_i32_1 = arith.constant 0 : i32
    return %c0_i32, %c0_i32_0 : i32, i32
  }
  func.func @transform_6(%arg0: i32, %arg1: i32) -> (i32, i32, i32) {
    %c0_i32 = arith.constant 0 : i32
    %c0_i32_0 = arith.constant 0 : i32
    return %arg0, %arg1, %c0_i32 : i32, i32, i32
  }
}

</mosaic_0001>

<bundles_post_ra>
// kernel: residual_conv_block.5
= control target key start
LH: loop header
LB: loop body
LE: loop exit
PB: predicated region body
PF: predicated region fallthrough
CT: control target
= control target key end

     0   :  { %s517_s21 = smov 0   ;;  %s519_s22 = smov 0   ;;  %s562_s0 = inlined_call_operand.vmem [shape: f32[2,8,128], index: 0, kind: input, shape index: {}]   ;;  %s563_s1 = inlined_call_operand.vmem [shape: f32[2,8,128], index: 1, kind: input, shape index: {}]   ;;  %s564_s2 = inlined_call_operand.vmem [shape: f32[1,128], index: 2, kind: input, shape index: {}]   ;;  %s565_s3 = inlined_call_operand.vmem [shape: f32[1,128], index: 3, kind: input, shape index: {}]   ;;  %s566_s4 = inlined_call_operand.vmem [shape: f32[1,128], index: 4, kind: input, shape index: {}]   ;;  %s567_s5 = inlined_call_operand.vmem [shape: f32[1,128], index: 5, kind: input, shape index: {}]   ;;  %s568_s6 = inlined_call_operand.vmem [shape: f32[2,8,128], index: 6, kind: output, shape index: {}]  }
   0x1   :  { %s521_s23 = smov 0  }
   0x2 LB: > { %s28_s24 = sadd.s32 1, %s476_s22  ;;  %p424_p0 = scmp.ge.s32.totalorder %s480_s23, 1  ;;  %s480_s23 = sphi %s521_s23, %s16_s23   ;;  %s476_s22 = sphi %s519_s22, %s570_s22   ;;  %s472_s21 = sphi %s517_s21, %s569_s21  }
   0x3   : > { %p30_p1 = scmp.ge.s32.totalorder %s28_s24, 2  ;;  %p244_p2 = scmp.lt.s32.totalorder %s480_s23, 3 }
   0x5   : > { %s572_s24 = smov (%p30_p1, %s28_s24), 0  ;;  %p245_p3 = pnand %p424_p0, %p244_p2 }
   0x6   : > { %p285_p4 = scmp.lt.s32.totalorder (!%p245_p3), %s472_s21, 1 }
   0x7   : > { %248 = sbr.rel (%p245_p3) target bundleno = 27 (0x1b), region = 44 }
   0xc   : > { %s574_s21 = smov (!%p285_p4, %s472_s21), 1  ;;  %v454_v0 = vld [vmem:[%s564_s2] ss:$0 sm:$0xff] }
   0xd   : > { %v456_v1 = vld [vmem:[%s566_s4] ss:$0 sm:$0xff]  ;;  %s425_s29 = sshll.u32 %s574_s21, 3 }
   0xe   : > { %s291_s8 = scalar_lea.vmem %s562_s0, %s425_s29  ;;  %s298_s11 = scalar_lea.vmem %s563_s1, %s425_s29  ;;  %v455_v2 = vld [vmem:[%s565_s3] ss:$0 sm:$0xff] }
   0xf   : > { %v457_v3 = vld [vmem:[%s567_s5] ss:$0 sm:$0xff]  ;;  %s305_s18 = scalar_lea.vmem %s568_s6, %s425_s29 }
  0x10   : > { %v307_v4 = vld [vmem:[%s291_s8] sm:$0xff] }
  0x11   : > { %v318_v5 = vld [vmem:[%s298_s11] sm:$0xff]  ;;  %v311_v6 = vmul.f32 %v454_v0, %v307_v4 }
  0x12   : > { %v322_v7 = vmul.f32 %v456_v1, %v318_v5 }
  0x13   : > { %v316_v8 = vadd.f32 %v455_v2, %v311_v6 }
  0x14   : > { %v327_v9 = vadd.f32 %v457_v3, %v322_v7 }
  0x16   : > { %v328_v10 = vadd.f32 %v327_v9, %v316_v8 }
  0x18   : > { %v329_v11 = vmax.f32 %v328_v10, 0.0 }
  0x1a   : > { %330 = vst [vmem:[%s305_s18] sm:$0xff] %v329_v11 }
  0x1b PF: > { %s16_s23 = sadd.s32 1, %s480_s23   ;;  %s569_s21 = smov %s476_s22 }
  0x1c   : > { %p13_p5 = scmp.ge.s32.totalorder %s16_s23, 4   ;;  %s570_s22 = smov %s572_s24 }
  0x1e   :  { %15 = sbr.rel (!%p13_p5) target bundleno = 2 (0x2), region = 77 }

// kernel: residual_conv_block.3
= control target key start
LH: loop header
LB: loop body
LE: loop exit
PB: predicated region body
PF: predicated region fallthrough
CT: control target
= control target key end

     0   :  { %s707_s18 = smov 0   ;;  %s709_s19 = smov 0   ;;  %s851_s0 = inlined_call_operand.vmem [shape: f32[2,8,128], index: 0, kind: input, shape index: {}]   ;;  %s852_s1 = inlined_call_operand.vmem [shape: f32[128,128], index: 1, kind: input, shape index: {}]   ;;  %s853_s2 = inlined_call_operand.vmem [shape: f32[128,128], index: 2, kind: input, shape index: {}]   ;;  %s854_s3 = inlined_call_operand.vmem [shape: f32[2,8,128], index: 3, kind: output, shape index: {0}]   ;;  %s855_s4 = inlined_call_operand.vmem [shape: f32[2,8,128], index: 4, kind: output, shape index: {1}]   ;;  %s856_s5 = inlined_call_operand.vmem [shape: f32[2,4,128], index: 5, kind: output, shape index: {2}]  }
   0x1   :  { %s711_s20 = smov 0  }
   0x2 LB: > { %s28_s21 = sadd.s32 1, %s669_s19  ;;  %p614_p0 = scmp.ge.s32.totalorder %s673_s20, 1  ;;  %s673_s20 = sphi %s711_s20, %s16_s20   ;;  %s669_s19 = sphi %s709_s19, %s858_s19   ;;  %s665_s18 = sphi %s707_s18, %s857_s18  }
   0x3   : > { %p30_p1 = scmp.ge.s32.totalorder %s28_s21, 2  ;;  %p212_p2 = scmp.lt.s32.totalorder %s673_s20, 3 }
   0x5   : > { %s860_s21 = smov (%p30_p1, %s28_s21), 0  ;;  %p213_p3 = pnand %p614_p0, %p212_p2 }
   0x6   : > { %p255_p4 = scmp.lt.s32.totalorder (!%p213_p3), %s665_s18, 1 }
   0x7   : > { %216 = sbr.rel (%p213_p3) target bundleno = 319 (0x13f), region = 32 }
   0xc   : > { %v296_v0 = vld [vmem:[%s852_s1 + $0x78] sm:$0xff]  ;;  %v295_v2 = vld [vmem:[%s852_s1 + $0x70] sm:$0xff]  ;;  %v294_v4 = vld [vmem:[%s852_s1 + $0x68] sm:$0xff]  ;;  %s862_s18 = smov (!%p255_p4, %s665_s18), 1  ;;  %v675_v10 = vmov 0.0   ;;  %vm355_vm0 = vcmask 64512  }
   0xd   : > { %v332_v1 = vld [vmem:[%s853_s2 + $0x78] sm:$0xff]  ;;  %297 = vmatpush.msra.mxu0 %v296_v0  ;;  %v331_v3 = vld [vmem:[%s853_s2 + $0x70] sm:$0xff]  ;;  %v330_v5 = vld [vmem:[%s853_s2 + $0x68] sm:$0xff]  ;;  %s618_s13 = sshll.u32 %s862_s18, 2  ;;  %s615_s12 = sshll.u32 %s862_s18, 3  ;;  %v676_v38 = vmov 1.0  }
   0xe   : > { %333 = vmatpush.msra.mxu1 %v332_v1  ;;  %v293_v6 = vld [vmem:[%s852_s1 + $0x60] sm:$0xff]  ;;  %s755_s16 = scalar_lea.vmem %s856_s5, %s618_s13  ;;  %v292_v8 = vld [vmem:[%s852_s1 + $0x58] sm:$0xff]  ;;  %v291_v11 = vld [vmem:[%s852_s1 + $0x50] sm:$0xff]  ;;  %s261_s27 = scalar_lea.vmem %s851_s0, %s615_s12  ;;  %vm450_vm1 = vcmask 1040384   ;;  %vm452_vm2 = vcmask 1041408   ;;  %vm454_vm3 = vcmask 1042432  }
   0xf   : > { %298 = vmatpush.msra.mxu0 %v295_v2  ;;  %v329_v7 = vld [vmem:[%s853_s2 + $0x60] sm:$0xff]  ;;  %v328_v9 = vld [vmem:[%s853_s2 + $0x58] sm:$0xff]  ;;  %460 = vst [vmem:[%s755_s16] sm:$0xf] %v675_v10  ;;  %v327_v12 = vld [vmem:[%s853_s2 + $0x50] sm:$0xff]  ;;  %s268_s9 = scalar_lea.vmem %s854_s3, %s615_s12  ;;  %s275_s13 = scalar_lea.vmem %s855_s4, %s615_s12 }
  0x10   : > { %334 = vmatpush.msra.mxu1 %v331_v3  ;;  %v290_v13 = vld [vmem:[%s852_s1 + $0x48] sm:$0xff]  ;;  %v289_v15 = vld [vmem:[%s852_s1 + $0x40] sm:$0xff]  ;;  %v288_v17 = vld [vmem:[%s852_s1 + $0x38] sm:$0xff] }
  0x11   : > { %299 = vmatpush.msra.mxu0 %v294_v4  ;;  %v326_v14 = vld [vmem:[%s853_s2 + $0x48] sm:$0xff]  ;;  %v325_v16 = vld [vmem:[%s853_s2 + $0x40] sm:$0xff]  ;;  %v324_v18 = vld [vmem:[%s853_s2 + $0x38] sm:$0xff] }
  0x12   : > { %335 = vmatpush.msra.mxu1 %v330_v5  ;;  %v287_v19 = vld [vmem:[%s852_s1 + $0x30] sm:$0xff]  ;;  %v286_v21 = vld [vmem:[%s852_s1 + $0x28] sm:$0xff]  ;;  %v285_v23 = vld [vmem:[%s852_s1 + $0x20] sm:$0xff] }
  0x13   : > { %300 = vmatpush.msra.mxu0 %v293_v6  ;;  %v323_v20 = vld [vmem:[%s853_s2 + $0x30] sm:$0xff]  ;;  %v322_v22 = vld [vmem:[%s853_s2 + $0x28] sm:$0xff]  ;;  %v321_v24 = vld [vmem:[%s853_s2 + $0x20] sm:$0xff] }
  0x14   : > { %336 = vmatpush.msra.mxu1 %v329_v7  ;;  %v284_v25 = vld [vmem:[%s852_s1 + $0x18] sm:$0xff]  ;;  %v283_v27 = vld [vmem:[%s852_s1 + $0x10] sm:$0xff]  ;;  %v282_v29 = vld [vmem:[%s852_s1 + $0x8] sm:$0xff] }
  0x15   : > { %301 = vmatpush.msra.mxu0 %v292_v8  ;;  %v320_v26 = vld [vmem:[%s853_s2 + $0x18] sm:$0xff]  ;;  %v319_v28 = vld [vmem:[%s853_s2 + $0x10] sm:$0xff]  ;;  %v318_v30 = vld [vmem:[%s853_s2 + $0x8] sm:$0xff] }
  0x16   : > { %337 = vmatpush.msra.mxu1 %v328_v9  ;;  %v281_v31 = vld [vmem:[%s852_s1] sm:$0xff] }
  0x17   : > { %302 = vmatpush.msra.mxu0 %v291_v11  ;;  %v317_v32 = vld [vmem:[%s853_s2] sm:$0xff] }
  0x18   : > { %338 = vmatpush.msra.mxu1 %v327_v12  ;;  %v280_v33 = vld [vmem:[%s261_s27] sm:$0xff] }
  0x19   : > { %303 = vmatpush.msra.mxu0 %v290_v13  ;;  %v461_v48 = vld [vmem:[%s755_s16] sm:$0xf] }
  0x1a   : > { %339 = vmatpush.msra.mxu1 %v326_v14 }
  0x1b   : > { %304 = vmatpush.msra.mxu0 %v289_v15 }
  0x1c   : > { %340 = vmatpush.msra.mxu1 %v325_v16 }
  0x1d   : > { %305 = vmatpush.msra.mxu0 %v288_v17 }
  0x1e   : > { %341 = vmatpush.msra.mxu1 %v324_v18 }
  0x1f   : > { %306 = vmatpush.msra.mxu0 %v287_v19 }
  0x20   : > { %342 = vmatpush.msra.mxu1 %v323_v20 }
  0x21   : > { %307 = vmatpush.msra.mxu0 %v286_v21 }
  0x22   : > { %343 = vmatpush.msra.mxu1 %v322_v22 }
  0x23   : > { %308 = vmatpush.msra.mxu0 %v285_v23 }
  0x24   : > { %344 = vmatpush.msra.mxu1 %v321_v24 }
  0x25   : > { %309 = vmatpush.msra.mxu0 %v284_v25 }
  0x26   : > { %345 = vmatpush.msra.mxu1 %v320_v26 }
  0x27   : > { %310 = vmatpush.msra.mxu0 %v283_v27 }
  0x28   : > { %346 = vmatpush.msra.mxu1 %v319_v28 }
  0x29   : > { %311 = vmatpush.msra.mxu0 %v282_v29 }
  0x2a   : > { %347 = vmatpush.msra.mxu1 %v318_v30 }
  0x2b   : > { %312 = vmatpush.msra.mxu0 %v281_v31 }
  0x2c   : > { %348 = vmatpush.msra.mxu1 %v317_v32  ;;  %313 = vmatmul.f32.vlgmr.msra.gmra.mxu0 %v280_v33 }
  0x2d   : > { %349 = vmatmul.f32.vlgmr.msra.gmra.mxu1 %v280_v33 }
  0xa9   : > { %v314_v34 = vpop.f32.mrf.mxu0 }
  0xaa   : > { %v350_v35 = vpop.f32.mrf.mxu1  ;;  %353 = vst [vmem:[%s268_s9] sm:$0xff] %v314_v34  ;;  %374 = vmatpush.msra.mxu2 %v314_v34  ;;  %v379_v36 = vmul.f32 %v314_v34, %v314_v34 }
  0xab   : > { %v420_v37 = vmul.f32 %v350_v35, %v350_v35  ;;  %354 = vst [vmem:[%s275_s13] sm:$0xff] %v350_v35  ;;  %619 = vmatmul.msk.f32.vlgmr.msra.gmra.mxu2 %vm355_vm0, %v676_v38 }
  0xac   : > { %415 = vmatpush.msrb.mxu2 %v350_v35  ;;  %395 = vmatpush.msra.mxu3 %v379_v36 }
  0xad   : > { %620 = vmatmul.msk.f32.vlgmr.msra.gmra.mxu3 %vm355_vm0, %v676_v38 }
  0xae   : > { %436 = vmatpush.msrb.mxu3 %v420_v37 }
  0xb3   : > { %621 = vmatmul.msk.f32.vlgmr.msrb.gmra.mxu2 %vm355_vm0, %v676_v38 }
  0xb5   : > { %622 = vmatmul.msk.f32.vlgmr.msrb.gmra.mxu3 %vm355_vm0, %v676_v38 }
 0x12e   : > { %v376_v39 = vpop.f32.mrf.mxu2 }
 0x130   : > { %v397_v40 = vpop.f32.mrf.mxu3 }
 0x131   : > { %v442_v41 = vrot.slane %v397_v40, 7 }
 0x133   : > { %v451_v44 = vsel %vm450_vm1, %v376_v39, %v442_v41 }
 0x136   : > { %v417_v42 = vpop.f32.mrf.mxu2 }
 0x137   : > { %v445_v43 = vrot.slane %v417_v42, 6 }
 0x138   : > { %v438_v45 = vpop.f32.mrf.mxu3 }
 0x139   : > { %v453_v46 = vsel %vm452_vm2, %v451_v44, %v445_v43  ;;  %v448_v47 = vrot.slane %v438_v45, 5 }
 0x13b   : > { %v455_v49 = vsel %vm454_vm3, %v453_v46, %v448_v47 }
 0x13c   : > { %v462_v50 = vadd.f32 %v461_v48, %v455_v49 }
 0x13e   : > { %463 = vst [vmem:[%s755_s16] sm:$0xf] %v462_v50 }
 0x13f PF: > { %s16_s20 = sadd.s32 1, %s673_s20   ;;  %s857_s18 = smov %s669_s19 }
 0x140   : > { %p13_p5 = scmp.ge.s32.totalorder %s16_s20, 4   ;;  %s858_s19 = smov %s860_s21 }
 0x142   :  { %15 = sbr.rel (!%p13_p5) target bundleno = 2 (0x2), region = 90 }

// kernel: residual_conv_block.4
= control target key start
LH: loop header
LB: loop body
LE: loop exit
PB: predicated region body
PF: predicated region fallthrough
CT: control target
= control target key end

     0   :  { %s592_s18 = smov 0   ;;  %s776_s0 = inlined_call_operand.vmem [shape: f32[2,8,128], index: 0, kind: input, shape index: {}]   ;;  %s777_s1 = inlined_call_operand.vmem [shape: f32[1,128], index: 1, kind: input, shape index: {}]   ;;  %s778_s2 = inlined_call_operand.vmem [shape: f32[1,128], index: 2, kind: input, shape index: {}]   ;;  %s779_s3 = inlined_call_operand.vmem [shape: f32[3,128,128], index: 3, kind: input, shape index: {}]   ;;  %s780_s4 = inlined_call_operand.vmem [shape: f32[2,8,128], index: 4, kind: output, shape index: {0}]   ;;  %s781_s5 = inlined_call_operand.vmem [shape: f32[2,2,128], index: 5, kind: output, shape index: {1}]  }
   0x1 LB: > { %s496_s19 = sadd.s32 4294967295, %s558_s18   ;;  %p500_p0 = scmp.ge.s32.totalorder %s558_s18, 1  ;;  %s558_s18 = sphi %s592_s18, %s16_s18  }
   0x2   : > { %p189_p1 = scmp.lt.s32.totalorder %s558_s18, 3 }
   0x4   : > { %p190_p2 = pnand %p500_p0, %p189_p1 }
   0x5   : > { %p615_p3 = scmp.lt.s32.totalorder (!%p190_p2), %s496_s19, 1 }
   0x6   : > { %193 = sbr.rel (%p190_p2) target bundleno = 322 (0x142), region = 36 }
   0xb   : > { %v535_v0 = vld [vmem:[%s779_s3 + $0x178] sm:$0xff]  ;;  %v534_v1 = vld [vmem:[%s779_s3 + $0x170] sm:$0xff]  ;;  %v560_v5 = vmov 0.0   ;;  %v533_v6 = vld [vmem:[%s779_s3 + $0x168] sm:$0xff]  ;;  %s784_s19 = smov (!%p615_p3, %s496_s19), 1  ;;  %vm361_vm0 = vcmask 64512  }
   0xc   : > { %v519_v2 = vld [vmem:[%s779_s3 + $0xf8] sm:$0xff]  ;;  %339 = vmatpush.msra.mxu2 %v535_v0  ;;  %v518_v4 = vld [vmem:[%s779_s3 + $0xf0] sm:$0xff]  ;;  %243 = vst [vmem:[#allocation2] sm:$0xff] %v560_v5  ;;  %v517_v8 = vld [vmem:[%s779_s3 + $0xe8] sm:$0xff]  ;;  %s501_s9 = sshll.u32 %s784_s19, 3  ;;  %v561_v63 = vmov 1.0  }
   0xd   : > { %281 = vmatpush.msra.mxu0 %v519_v2  ;;  %v262_v3 = vld [vmem:[%s779_s3 + $0x78] sm:$0xff]  ;;  %v261_v7 = vld [vmem:[%s779_s3 + $0x70] sm:$0xff]  ;;  %244 = vst [vmem:[#allocation2 + $0x8] sm:$0x3] %v560_v5  ;;  %v260_v9 = vld [vmem:[%s779_s3 + $0x68] sm:$0xff]  ;;  %s222_s24 = scalar_lea.vmem %s776_s0, %s501_s9  ;;  %s226_s13 = scalar_lea.vmem %s780_s4, %s501_s9  ;;  %vm409_vm1 = vcmask 1040384  }
   0xe   : > { %301 = vmatpush.msra.mxu1 %v262_v3  ;;  %340 = vmatpush.msra.mxu2 %v534_v1  ;;  %v532_v10 = vld [vmem:[%s779_s3 + $0x160] sm:$0xff]  ;;  %v531_v13 = vld [vmem:[%s779_s3 + $0x158] sm:$0xff]  ;;  %v530_v16 = vld [vmem:[%s779_s3 + $0x150] sm:$0xff]  ;;  %s503_s14 = sshll.u32 %s784_s19, 1 }
   0xf   : > { %282 = vmatpush.msra.mxu0 %v518_v4  ;;  %v516_v11 = vld [vmem:[%s779_s3 + $0xe0] sm:$0xff]  ;;  %v515_v14 = vld [vmem:[%s779_s3 + $0xd8] sm:$0xff]  ;;  %v514_v17 = vld [vmem:[%s779_s3 + $0xd0] sm:$0xff]  ;;  %s230_s17 = scalar_lea.vmem %s781_s5, %s503_s14 }
  0x10   : > { %302 = vmatpush.msra.mxu1 %v261_v7  ;;  %341 = vmatpush.msra.mxu2 %v533_v6  ;;  %v259_v12 = vld [vmem:[%s779_s3 + $0x60] sm:$0xff]  ;;  %v258_v15 = vld [vmem:[%s779_s3 + $0x58] sm:$0xff]  ;;  %v257_v18 = vld [vmem:[%s779_s3 + $0x50] sm:$0xff] }
  0x11   : > { %283 = vmatpush.msra.mxu0 %v517_v8  ;;  %v529_v19 = vld [vmem:[%s779_s3 + $0x148] sm:$0xff]  ;;  %v528_v22 = vld [vmem:[%s779_s3 + $0x140] sm:$0xff]  ;;  %v527_v24 = vld [vmem:[%s779_s3 + $0x138] sm:$0xff] }
  0x12   : > { %303 = vmatpush.msra.mxu1 %v260_v9  ;;  %342 = vmatpush.msra.mxu2 %v532_v10  ;;  %v513_v20 = vld [vmem:[%s779_s3 + $0xc8] sm:$0xff]  ;;  %v512_v23 = vld [vmem:[%s779_s3 + $0xc0] sm:$0xff]  ;;  %v511_v26 = vld [vmem:[%s779_s3 + $0xb8] sm:$0xff] }
  0x13   : > { %284 = vmatpush.msra.mxu0 %v516_v11  ;;  %v256_v21 = vld [vmem:[%s779_s3 + $0x48] sm:$0xff]  ;;  %v255_v25 = vld [vmem:[%s779_s3 + $0x40] sm:$0xff]  ;;  %v254_v27 = vld [vmem:[%s779_s3 + $0x38] sm:$0xff] }
  0x14   : > { %304 = vmatpush.msra.mxu1 %v259_v12  ;;  %343 = vmatpush.msra.mxu2 %v531_v13  ;;  %v232_v28 = vld [vmem:[%s222_s24] sm:$0xff]  ;;  %v526_v30 = vld [vmem:[%s779_s3 + $0x130] sm:$0xff]  ;;  %v525_v35 = vld [vmem:[%s779_s3 + $0x128] sm:$0xff] }
  0x15   : > { %285 = vmatpush.msra.mxu0 %v515_v14  ;;  %v550_v29 = vld [vmem:[%s777_s1] ss:$0 sm:$0xff]  ;;  %v510_v31 = vld [vmem:[%s779_s3 + $0xb0] sm:$0xff]  ;;  %v509_v36 = vld [vmem:[%s779_s3 + $0xa8] sm:$0xff] }
  0x16   : > { %305 = vmatpush.msra.mxu1 %v258_v15  ;;  %344 = vmatpush.msra.mxu2 %v530_v16  ;;  %v551_v32 = vld [vmem:[%s778_s2] ss:$0 sm:$0xff]  ;;  %v253_v33 = vld [vmem:[%s779_s3 + $0x30] sm:$0xff]  ;;  %v236_v34 = vmul.f32 %v550_v29, %v232_v28  ;;  %v252_v37 = vld [vmem:[%s779_s3 + $0x28] sm:$0xff] }
  0x17   : > { %286 = vmatpush.msra.mxu0 %v514_v17  ;;  %v524_v39 = vld [vmem:[%s779_s3 + $0x120] sm:$0xff]  ;;  %v523_v43 = vld [vmem:[%s779_s3 + $0x118] sm:$0xff]  ;;  %v522_v46 = vld [vmem:[%s779_s3 + $0x110] sm:$0xff] }
  0x18   : > { %306 = vmatpush.msra.mxu1 %v257_v18  ;;  %345 = vmatpush.msra.mxu2 %v529_v19  ;;  %v241_v38 = vadd.f32 %v551_v32, %v236_v34  ;;  %v508_v40 = vld [vmem:[%s779_s3 + $0xa0] sm:$0xff]  ;;  %v507_v44 = vld [vmem:[%s779_s3 + $0x98] sm:$0xff]  ;;  %v506_v47 = vld [vmem:[%s779_s3 + $0x90] sm:$0xff] }
  0x19   : > { %287 = vmatpush.msra.mxu0 %v513_v20  ;;  %v251_v41 = vld [vmem:[%s779_s3 + $0x20] sm:$0xff]  ;;  %v250_v45 = vld [vmem:[%s779_s3 + $0x18] sm:$0xff]  ;;  %v249_v48 = vld [vmem:[%s779_s3 + $0x10] sm:$0xff] }
  0x1a   : > { %307 = vmatpush.msra.mxu1 %v256_v21  ;;  %346 = vmatpush.msra.mxu2 %v528_v22  ;;  %v242_v42 = vmax.f32 %v241_v38, 0.0  ;;  %v521_v49 = vld [vmem:[%s779_s3 + $0x108] sm:$0xff]  ;;  %v520_v52 = vld [vmem:[%s779_s3 + $0x100] sm:$0xff] }
  0x1b   : > { %288 = vmatpush.msra.mxu0 %v512_v23  ;;  %v505_v50 = vld [vmem:[%s779_s3 + $0x88] sm:$0xff]  ;;  %v504_v53 = vld [vmem:[%s779_s3 + $0x80] sm:$0xff] }
  0x1c   : > { %308 = vmatpush.msra.mxu1 %v255_v25  ;;  %347 = vmatpush.msra.mxu2 %v527_v24  ;;  %245 = vst [vmem:[#allocation2 + $0x1] sm:$0xff] %v242_v42  ;;  %v248_v51 = vld [vmem:[%s779_s3 + $0x8] sm:$0xff]  ;;  %v247_v54 = vld [vmem:[%s779_s3] sm:$0xff] }
  0x1d   : > { %289 = vmatpush.msra.mxu0 %v511_v26 }
  0x1e   : > { %309 = vmatpush.msra.mxu1 %v254_v27  ;;  %348 = vmatpush.msra.mxu2 %v526_v30 }
  0x1f   : > { %290 = vmatpush.msra.mxu0 %v510_v31 }
  0x20   : > { %310 = vmatpush.msra.mxu1 %v253_v33  ;;  %349 = vmatpush.msra.mxu2 %v525_v35 }
  0x21   : > { %291 = vmatpush.msra.mxu0 %v509_v36 }
  0x22   : > { %311 = vmatpush.msra.mxu1 %v252_v37  ;;  %350 = vmatpush.msra.mxu2 %v524_v39 }
  0x23   : > { %292 = vmatpush.msra.mxu0 %v508_v40  ;;  %v321_v55 = vld [vmem:[#allocation2 + $0x2] sm:$0xff] }
  0x24   : > { %312 = vmatpush.msra.mxu1 %v251_v41  ;;  %351 = vmatpush.msra.mxu2 %v523_v43  ;;  %v246_v56 = vld [vmem:[#allocation2] sm:$0xff] }
  0x25   : > { %293 = vmatpush.msra.mxu0 %v507_v44 }
  0x26   : > { %313 = vmatpush.msra.mxu1 %v250_v45  ;;  %352 = vmatpush.msra.mxu2 %v522_v46 }
  0x27   : > { %294 = vmatpush.msra.mxu0 %v506_v47 }
  0x28   : > { %314 = vmatpush.msra.mxu1 %v249_v48  ;;  %353 = vmatpush.msra.mxu2 %v521_v49 }
  0x29   : > { %295 = vmatpush.msra.mxu0 %v505_v50 }
  0x2a   : > { %315 = vmatpush.msra.mxu1 %v248_v51  ;;  %354 = vmatpush.msra.mxu2 %v520_v52 }
  0x2b   : > { %296 = vmatpush.msra.mxu0 %v504_v53  ;;  %355 = vmatmul.f32.vlgmr.msra.gmra.mxu2 %v321_v55 }
  0x2c   : > { %316 = vmatpush.msra.mxu1 %v247_v54  ;;  %297 = vmatmul.f32.vlgmr.msra.gmra.mxu0 %v242_v42 }
  0x2d   : > { %317 = vmatmul.f32.vlgmr.msra.gmra.mxu1 %v246_v56 }
  0xa9   : > { %v298_v57 = vpop.f32.mrf.mxu0 }
  0xaa   : > { %v318_v58 = vpop.f32.mrf.mxu1 }
  0xab   : > { %v319_v59 = vadd.f32 %v318_v58, %v298_v57 }
  0xae   : > { %v356_v60 = vpop.f32.mrf.mxu2 }
  0xaf   : > { %v359_v61 = vadd.f32 %v356_v60, %v319_v59 }
  0xb1   : > { %360 = vst [vmem:[%s226_s13] sm:$0xff] %v359_v61  ;;  %380 = vmatpush.msra.mxu3 %v359_v61  ;;  %v385_v62 = vmul.f32 %v359_v61, %v359_v61 }
  0xb2   : > { %536 = vmatmul.msk.f32.vlgmr.msra.gmra.mxu3 %vm361_vm0, %v561_v63 }
  0xb3   : > { %401 = vmatpush.msrb.mxu3 %v385_v62 }
  0xba   : > { %537 = vmatmul.msk.f32.vlgmr.msrb.gmra.mxu3 %vm361_vm0, %v561_v63 }
 0x135   : > { %v382_v0 = vpop.f32.mrf.mxu3 }
 0x13d   : > { %v403_v1 = vpop.f32.mrf.mxu3 }
 0x13e   : > { %v407_v2 = vrot.slane %v403_v1, 7 }
 0x140   : > { %v410_v3 = vsel %vm409_vm1, %v382_v0, %v407_v2 }
 0x141   : > { %411 = vst [vmem:[%s230_s17] sm:$0x3] %v410_v3 }
 0x142 PF: > { %s16_s18 = sadd.s32 1, %s558_s18  }
 0x143   : > { %p13_p4 = scmp.ge.s32.totalorder %s16_s18, 4  }
 0x145   :  { %15 = sbr.rel (!%p13_p4) target bundleno = 1 (0x1), region = 80 }

</bundles_post_ra>
